<compile_context>
chip_gen: v7x
topology: tpu7x:2x2x1
jax: 0.10.0
libtpu: 0.0.40
codegen_flags: <defaults>
</compile_context>

<pallas_src>
import functools

import jax
import jax.numpy as jnp
import numpy as np
from jax.experimental import pallas as pl
from jax.experimental.pallas import tpu as pltpu


def posenet_kernel(x_ref, w_lat_ref, b_lat_ref, w_head_ref, b_head_ref,
                   pose_ref, acc_ref, *, inv_hw, spatial_axis):
    """One (batch-tile, spatial-tile) grid step.

    x_ref    : (TN, C, TS) [NCHW path] or (TN, TS, C) [NHWC path] feature-map slab
    acc_ref  : (TN, C)     f32 running spatial sum (VMEM scratch, lives across the grid)
    pose_ref : (TN, 7)     output, written only on the last spatial step
    weights  : full arrays, resident in VMEM for the whole kernel
    """
    s = pl.program_id(1)

    @pl.when(s == 0)
    def _init():
        acc_ref[...] = jnp.zeros_like(acc_ref)

    # Upcast immediately after load (bf16 streaming is safe on v5e too);
    # pooling accumulation stays in f32.
    x = x_ref[...].astype(jnp.float32)
    acc_ref[...] += jnp.sum(x, axis=spatial_axis)                             # (TN, C)

    @pl.when(s == pl.num_programs(1) - 1)
    def _finalize():
        # AdaptiveAvgPool2d(1) + flatten == mean over the H*W positions.
        feat = acc_ref[...] * inv_hw                                          # (TN, C)
        # fc_latent + ReLU (Dropout is identity in eval mode).
        lat = jnp.dot(feat, w_lat_ref[...],
                      preferred_element_type=jnp.float32) + b_lat_ref[...]    # (TN, L)
        lat = jnp.maximum(lat, 0.0)
        # position_reg (3) and orientation_reg (4) fused into one (L, 7) head;
        # columns [0:3] = p_x, [3:7] = p_q  ==  torch.cat((p_x, p_q), dim=1).
        pose = jnp.dot(lat, w_head_ref[...],
                       preferred_element_type=jnp.float32) + b_head_ref[...]  # (TN, 7)
        pose_ref[...] = pose.astype(pose_ref.dtype)


def _vmem_capacity_bytes():
    """Per-core VMEM capacity; conservative 64 MiB fallback if the query is unavailable."""
    try:
        return int(pltpu.get_tpu_info().vmem_capacity_bytes)
    except Exception:
        return 64 << 20


def _tile_options(extent, granularity):
    """Valid tile sizes: multiples of `granularity` dividing `extent`, plus the full extent."""
    opts = [t for t in range(granularity, extent + 1, granularity) if extent % t == 0]
    if extent not in opts:
        opts.append(extent)
    return sorted(set(opts))


def _pick_tiles(n, s, c, itemsize, *, spatial_granularity, block_budget):
    """Choose (batch_tile, spatial_tile).

    Preference order: (1) >= 2 batch tiles so v7x's second TensorCore gets work on the
    "parallel" axis, (2) the feature block fits the generation-aware budget, (3) the block is
    as large as possible (fewer grid steps -> less per-step overhead, DMA near HBM roofline).
    """
    tn_opts = _tile_options(n, 8)                  # output block (TN, 7): TN mult-of-8 or N
    ts_opts = _tile_options(s, spatial_granularity)

    best_key, best = None, None
    for tn in tn_opts:
        fitting = [t for t in ts_opts if tn * c * t * itemsize <= block_budget]
        ts = fitting[-1] if fitting else ts_opts[0]
        block = tn * c * ts * itemsize
        fits = block <= block_budget
        parallel = (n // tn) >= 2
        key = (parallel, fits, block if fits else -block)
        if best_key is None or key > best_key:
            best_key, best = key, (tn, ts)
    # TODO(synk): when N is too small for >= 2 batch tiles (e.g. N <= 8), a 2-way core-parallel
    # split of the spatial reduction (per-core partial accumulators) would fill v7x's 2nd core.
    return best


def residual_posenet_forward(feat, params, *, data_format="NHWC",
                             stream_dtype=jnp.bfloat16,
                             batch_tile=None, spatial_tile=None):
    """AdaptiveAvgPool2d(1) + flatten + fc_latent + ReLU + [position_reg | orientation_reg].

    feat: backbone feature map, (N, H, W, C) when data_format == "NHWC" (preferred: C is
          lane-dense) or (N, C, H, W) when data_format == "NCHW".
    stream_dtype: dtype the big feature map is streamed in (default bf16 halves HBM bytes;
          all accumulation stays f32 inside the kernel). None keeps the input dtype.
    """
    if data_format == "NHWC":
        n, h, w, c = feat.shape
        s = h * w
        x = feat.reshape(n, s, c)          # free contiguous reshape, no transpose pass
        spatial_axis, spatial_granularity = 1, 8
    elif data_format == "NCHW":
        n, c, h, w = feat.shape
        s = h * w
        x = feat.reshape(n, c, s)          # free contiguous reshape, no transpose pass
        spatial_axis, spatial_granularity = 2, 128
    else:
        raise ValueError(f"unknown data_format: {data_format}")

    if stream_dtype is not None and x.dtype != stream_dtype:
        x = x.astype(stream_dtype)

    w_lat, b_lat, w_head, b_head = params
    latent = w_lat.shape[1]

    # Generation-aware sizing: bigger blocks / limits on 128 MiB chips (v5e/v6e) than on
    # 64 MiB v7x, always leaving headroom for compiler-internal scratch.
    vmem_capacity = _vmem_capacity_bytes()
    if vmem_capacity <= (64 << 20):          # v7x-class core (64 MiB VMEM)
        block_budget = 12 << 20
        vmem_ceiling = vmem_capacity - (12 << 20)
    else:                                     # v5e / v6e (128 MiB VMEM)
        block_budget = 24 << 20
        vmem_ceiling = vmem_capacity - (24 << 20)

    tn, ts = _pick_tiles(n, s, c, x.dtype.itemsize,
                         spatial_granularity=spatial_granularity,
                         block_budget=block_budget)
    if batch_tile is not None:
        tn = batch_tile
    if spatial_tile is not None:
        ts = spatial_tile
    assert n % tn == 0 and s % ts == 0, (n, tn, s, ts)
    grid = (n // tn, s // ts)

    if data_format == "NHWC":
        x_spec = pl.BlockSpec((tn, ts, c), lambda i, j: (i, j, 0))
    else:
        x_spec = pl.BlockSpec((tn, c, ts), lambda i, j: (i, 0, j))

    weight_bytes = sum(int(p.size) * p.dtype.itemsize
                       for p in (w_lat, b_lat, w_head, b_head))
    block_bytes = tn * c * ts * x.dtype.itemsize
    # Double-buffered feature slab + single-buffered resident weights + accumulator + headroom;
    # never below the 32 MiB scoped default, never above the generation-aware ceiling.
    # TODO(synk): for very large C (EfficientNet-B7-class) where even a minimal block exceeds
    # the budget, a C grid axis with partial accumulation would be needed.
    needed = 2 * block_bytes + weight_bytes + tn * c * 4 + (2 << 20)
    vmem_limit = int(min(vmem_ceiling, max(32 << 20, needed)))

    flops = n * c * s + n * (2 * c * latent + 2 * latent * 7)
    bytes_accessed = int(x.size) * x.dtype.itemsize + weight_bytes + n * 7 * 4

    kernel = functools.partial(posenet_kernel, inv_hw=1.0 / float(s),
                               spatial_axis=spatial_axis)

    def _call(make_weight_spec):
        w_specs = [make_weight_spec(p) for p in (w_lat, b_lat, w_head, b_head)]
        return pl.pallas_call(
            kernel,
            out_shape=jax.ShapeDtypeStruct((n, 7), jnp.float32),
            grid_spec=pltpu.PrefetchScalarGridSpec(
                num_scalar_prefetch=0,
                grid=grid,
                in_specs=[x_spec] + w_specs,
                out_specs=pl.BlockSpec((tn, 7), lambda i, j: (i, 0)),
                scratch_shapes=[pltpu.VMEM((tn, c), jnp.float32)],
            ),
            compiler_params=pltpu.CompilerParams(
                dimension_semantics=("parallel", "arbitrary"),
                vmem_limit_bytes=vmem_limit,
            ),
            cost_estimate=pl.CostEstimate(
                flops=int(flops), transcendentals=0, bytes_accessed=int(bytes_accessed)),
        )(x, w_lat, b_lat, w_head, b_head)

    try:
        # Weights/biases: whole arrays resident in VMEM for the entire grid, single-buffered
        # (no per-step DMA and half the footprint of a double-buffered full-array block).
        return _call(lambda p: pl.BlockSpec(memory_space=pltpu.MemorySpace.VMEM))
    except Exception:
        # Robust fallback: constant-index_map full-array blocks (double-buffered, always valid).
        return _call(lambda p: pl.BlockSpec(p.shape, lambda i, j, nd=p.ndim: (0,) * nd))


def init_params(key, backbone_dim, latent_dim):
    """Kaiming-normal init (fan_in: std = sqrt(2 / fan_in)), zero biases — matches the module."""
    k1, k2, k3 = jax.random.split(key, 3)
    w_lat = jax.random.normal(k1, (backbone_dim, latent_dim), jnp.float32) * np.sqrt(
        2.0 / backbone_dim)
    b_lat = jnp.zeros((1, latent_dim), jnp.float32)
    w_pos = jax.random.normal(k2, (latent_dim, 3), jnp.float32) * np.sqrt(2.0 / latent_dim)
    w_ori = jax.random.normal(k3, (latent_dim, 4), jnp.float32) * np.sqrt(2.0 / latent_dim)
    w_head = jnp.concatenate([w_pos, w_ori], axis=1)           # (L, 7): [p_x | p_q]
    b_head = jnp.zeros((1, 7), jnp.float32)
    return w_lat, b_lat, w_head, b_head


def reference_forward(feat_nchw, params):
    w_lat, b_lat, w_head, b_head = params
    feat = jnp.mean(feat_nchw, axis=(2, 3))          # (N, C)
    lat = jnp.maximum(feat @ w_lat + b_lat, 0.0)     # (N, L)
    return lat @ w_head + b_head                     # (N, 7)


if __name__ == "__main__":
    N, C, H, W = 2, 32, 16, 16       # batch, backbone_dim, spatial (small test shapes)
    LATENT = 32

    key = jax.random.PRNGKey(0)
    k_feat, k_params = jax.random.split(key)
    # Synthetic backbone feature map (stands in for backbone.extract_features(img)).
    feat_nchw = jax.random.normal(k_feat, (N, C, H, W), jnp.float32)
    feat_nhwc = jnp.transpose(feat_nchw, (0, 2, 3, 1))   # "backbone emits NHWC" scenario
    params = init_params(k_params, C, LATENT)

    ref = jax.block_until_ready(reference_forward(feat_nchw, params))
    ref_bf16 = jax.block_until_ready(reference_forward(
        feat_nchw.astype(jnp.bfloat16).astype(jnp.float32), params))

    # 1) Preferred channels-last path, f32 stream, auto tile sizes.
    pose = jax.block_until_ready(residual_posenet_forward(
        feat_nhwc, params, data_format="NHWC", stream_dtype=jnp.float32))
    assert pose.shape == (N, 7)
    np.testing.assert_allclose(np.asarray(pose), np.asarray(ref), rtol=1e-4, atol=1e-4)

    # 2) Channels-last, default bf16 streaming, forced 4-step spatial reduction to exercise
    #    the accumulator / pl.when pipeline (compare against a bf16-rounded reference).
    pose_bf16 = jax.block_until_ready(residual_posenet_forward(
        feat_nhwc, params, data_format="NHWC", spatial_tile=64))
    np.testing.assert_allclose(np.asarray(pose_bf16), np.asarray(ref_bf16),
                               rtol=5e-3, atol=5e-3)

    # 3) NCHW path (backbone emits NCHW; no transpose pass over HBM), f32, 2 spatial steps.
    pose_nchw = jax.block_until_ready(residual_posenet_forward(
        feat_nchw, params, data_format="NCHW", stream_dtype=jnp.float32, spatial_tile=128))
    np.testing.assert_allclose(np.asarray(pose_nchw), np.asarray(ref), rtol=1e-4, atol=1e-4)

    print("KERNEL_OK")
</pallas_src>

<mosaic_0001>
module attributes {stable_mosaic.version = 11 : i64} {
  func.func @posenet_kernel(%arg0: i32, %arg1: i32, %arg2: memref<2x256x32xf32, #tpu.memory_space<vmem>>, %arg3: memref<32x32xf32, #tpu.memory_space<vmem>>, %arg4: memref<1x32xf32, #tpu.memory_space<vmem>>, %arg5: memref<32x7xf32, #tpu.memory_space<vmem>>, %arg6: memref<1x7xf32, #tpu.memory_space<vmem>>, %arg7: memref<2x7xf32, #tpu.memory_space<vmem>>, %arg8: memref<2x32xf32, #tpu.memory_space<vmem>>) attributes {dimension_semantics = [#tpu.dimension_semantics<parallel>, #tpu.dimension_semantics<arbitrary>], iteration_bounds = array<i64: 1, 1>, scalar_prefetch = 0 : i64, scratch_operands = 1 : i64, tpu.core_type = #tpu.core_type<tc>, window_params = [{transform_indices = @transform_0, window_bounds = array<i64: 2, 256, 32>}, {pipeline_mode = #tpu.pipeline_mode<synchronous>, transform_indices = @transform_1, window_bounds = array<i64: 32, 32>}, {pipeline_mode = #tpu.pipeline_mode<synchronous>, transform_indices = @transform_2, window_bounds = array<i64: 1, 32>}, {pipeline_mode = #tpu.pipeline_mode<synchronous>, transform_indices = @transform_3, window_bounds = array<i64: 32, 7>}, {pipeline_mode = #tpu.pipeline_mode<synchronous>, transform_indices = @transform_4, window_bounds = array<i64: 1, 7>}, {transform_indices = @transform_5, window_bounds = array<i64: 2, 7>}]} {
    %c0_i32 = arith.constant 0 : i32
    %0 = arith.cmpi eq, %arg1, %c0_i32 : i32
    %1 = arith.extui %0 : i1 to i32
    %c0_i32_0 = arith.constant 0 : i32
    %2 = arith.cmpi ne, %1, %c0_i32_0 : i32
    scf.if %2 {
      %cst_9 = arith.constant 0.000000e+00 : f32
      %11 = vector.broadcast %cst_9 : f32 to vector<2x32xf32>
      %c0_10 = arith.constant 0 : index
      %c0_11 = arith.constant 0 : index
      %12 = vector.load %arg8[%c0_10, %c0_11] : memref<2x32xf32, #tpu.memory_space<vmem>>, vector<2x32xf32>
      tpu.vector_store %arg8[%c0_10, %c0_11], %11 {strides = array<i32>} : memref<2x32xf32, #tpu.memory_space<vmem>>, vector<2x32xf32>,
    } else {
    }
    %c0 = arith.constant 0 : index
    %c0_1 = arith.constant 0 : index
    %c0_2 = arith.constant 0 : index
    %3 = vector.load %arg2[%c0, %c0_1, %c0_2] : memref<2x256x32xf32, #tpu.memory_space<vmem>>, vector<2x256x32xf32>
    %c0_3 = arith.constant 0 : index
    %c0_4 = arith.constant 0 : index
    %4 = vector.load %arg8[%c0_3, %c0_4] : memref<2x32xf32, #tpu.memory_space<vmem>>, vector<2x32xf32>
    %cst = arith.constant dense<0.000000e+00> : vector<2x32xf32>
    %5 = vector.multi_reduction <add>, %3, %cst [1] : vector<2x256x32xf32> to vector<2x32xf32>
    %6 = arith.addf %4, %5 : vector<2x32xf32>
    %c0_5 = arith.constant 0 : index
    %c0_6 = arith.constant 0 : index
    %7 = vector.load %arg8[%c0_5, %c0_6] : memref<2x32xf32, #tpu.memory_space<vmem>>, vector<2x32xf32>
    tpu.vector_store %arg8[%c0_5, %c0_6], %6 {strides = array<i32>} : memref<2x32xf32, #tpu.memory_space<vmem>>, vector<2x32xf32>,
    %c0_i32_7 = arith.constant 0 : i32
    %8 = arith.cmpi eq, %arg1, %c0_i32_7 : i32
    %9 = arith.extui %8 : i1 to i32
    %c0_i32_8 = arith.constant 0 : i32
    %10 = arith.cmpi ne, %9, %c0_i32_8 : i32
    scf.if %10 {
      %c0_9 = arith.constant 0 : index
      %c0_10 = arith.constant 0 : index
      %11 = vector.load %arg8[%c0_9, %c0_10] : memref<2x32xf32, #tpu.memory_space<vmem>>, vector<2x32xf32>
      %cst_11 = arith.constant 3.906250e-03 : f32
      %12 = vector.broadcast %cst_11 : f32 to vector<2x32xf32>
      %13 = arith.mulf %11, %12 : vector<2x32xf32>
      %c0_12 = arith.constant 0 : index
      %c0_13 = arith.constant 0 : index
      %14 = vector.load %arg3[%c0_12, %c0_13] : memref<32x32xf32, #tpu.memory_space<vmem>>, vector<32x32xf32>
      %cst_14 = arith.constant dense<0.000000e+00> : vector<2x32xf32>
      %15 = tpu.matmul %13, %14, %cst_14 {dimension_numbers = #tpu.dot_dimension_numbers<[1], [0], [0], [1], [0, 0, 1, 1], [], []>} : vector<2x32xf32>, vector<32x32xf32>, vector<2x32xf32> -> vector<2x32xf32>
      %c0_15 = arith.constant 0 : index
      %c0_16 = arith.constant 0 : index
      %16 = vector.load %arg4[%c0_15, %c0_16] : memref<1x32xf32, #tpu.memory_space<vmem>>, vector<1x32xf32>
      %17 = vector.broadcast %16 : vector<1x32xf32> to vector<2x32xf32>
      %18 = arith.addf %15, %17 : vector<2x32xf32>
      %cst_17 = arith.constant 0.000000e+00 : f32
      %19 = vector.broadcast %cst_17 : f32 to vector<2x32xf32>
      %20 = arith.maximumf %18, %19 : vector<2x32xf32>
      %c0_18 = arith.constant 0 : index
      %c0_19 = arith.constant 0 : index
      %21 = vector.load %arg5[%c0_18, %c0_19] : memref<32x7xf32, #tpu.memory_space<vmem>>, vector<32x7xf32>
      %cst_20 = arith.constant dense<0.000000e+00> : vector<2x7xf32>
      %22 = tpu.matmul %20, %21, %cst_20 {dimension_numbers = #tpu.dot_dimension_numbers<[1], [0], [0], [1], [0, 0, 1, 1], [], []>} : vector<2x32xf32>, vector<32x7xf32>, vector<2x7xf32> -> vector<2x7xf32>
      %c0_21 = arith.constant 0 : index
      %c0_22 = arith.constant 0 : index
      %23 = vector.load %arg6[%c0_21, %c0_22] : memref<1x7xf32, #tpu.memory_space<vmem>>, vector<1x7xf32>
      %24 = vector.broadcast %23 : vector<1x7xf32> to vector<2x7xf32>
      %25 = arith.addf %22, %24 : vector<2x7xf32>
      %c0_23 = arith.constant 0 : index
      %c0_24 = arith.constant 0 : index
      %26 = vector.load %arg7[%c0_23, %c0_24] : memref<2x7xf32, #tpu.memory_space<vmem>>, vector<2x7xf32>
      tpu.vector_store %arg7[%c0_23, %c0_24], %25 {strides = array<i32>} : memref<2x7xf32, #tpu.memory_space<vmem>>, vector<2x7xf32>,
    } else {
    }
    return
  }
  func.func @transform_0(%arg0: i32, %arg1: i32) -> (i32, i32, i32) {
    %c0_i32 = arith.constant 0 : i32
    %c0_i32_0 = arith.constant 0 : i32
    return %arg0, %arg1, %c0_i32 : i32, i32, i32
  }
  func.func @transform_1(%arg0: i32, %arg1: i32) -> (i32, i32) {
    %c0_i32 = arith.constant 0 : i32
    %c0_i32_0 = arith.constant 0 : i32
    %c0_i32_1 = arith.constant 0 : i32
    return %c0_i32, %c0_i32_0 : i32, i32
  }
  func.func @transform_2(%arg0: i32, %arg1: i32) -> (i32, i32) {
    %c0_i32 = arith.constant 0 : i32
    %c0_i32_0 = arith.constant 0 : i32
    %c0_i32_1 = arith.constant 0 : i32
    return %c0_i32, %c0_i32_0 : i32, i32
  }
  func.func @transform_3(%arg0: i32, %arg1: i32) -> (i32, i32) {
    %c0_i32 = arith.constant 0 : i32
    %c0_i32_0 = arith.constant 0 : i32
    %c0_i32_1 = arith.constant 0 : i32
    return %c0_i32, %c0_i32_0 : i32, i32
  }
  func.func @transform_4(%arg0: i32, %arg1: i32) -> (i32, i32) {
    %c0_i32 = arith.constant 0 : i32
    %c0_i32_0 = arith.constant 0 : i32
    %c0_i32_1 = arith.constant 0 : i32
    return %c0_i32, %c0_i32_0 : i32, i32
  }
  func.func @transform_5(%arg0: i32, %arg1: i32) -> (i32, i32) {
    %c0_i32 = arith.constant 0 : i32
    %c0_i32_0 = arith.constant 0 : i32
    return %arg0, %c0_i32 : i32, i32
  }
}

module attributes {stable_mosaic.version = 11 : i64} {
  func.func @posenet_kernel(%arg0: i32, %arg1: i32, %arg2: memref<2x256x32xf32, #tpu.memory_space<vmem>>, %arg3: memref<32x32xf32, #tpu.memory_space<vmem>>, %arg4: memref<1x32xf32, #tpu.memory_space<vmem>>, %arg5: memref<32x7xf32, #tpu.memory_space<vmem>>, %arg6: memref<1x7xf32, #tpu.memory_space<vmem>>, %arg7: memref<2x7xf32, #tpu.memory_space<vmem>>, %arg8: memref<2x32xf32, #tpu.memory_space<vmem>>) attributes {dimension_semantics = [#tpu.dimension_semantics<parallel>, #tpu.dimension_semantics<arbitrary>], iteration_bounds = array<i64: 1, 1>, scalar_prefetch = 0 : i64, scratch_operands = 1 : i64, tpu.core_type = #tpu.core_type<tc>, window_params = [{transform_indices = @transform_0, window_bounds = array<i64: 2, 256, 32>}, {pipeline_mode = #tpu.pipeline_mode<synchronous>, transform_indices = @transform_1, window_bounds = array<i64: 32, 32>}, {pipeline_mode = #tpu.pipeline_mode<synchronous>, transform_indices = @transform_2, window_bounds = array<i64: 1, 32>}, {pipeline_mode = #tpu.pipeline_mode<synchronous>, transform_indices = @transform_3, window_bounds = array<i64: 32, 7>}, {pipeline_mode = #tpu.pipeline_mode<synchronous>, transform_indices = @transform_4, window_bounds = array<i64: 1, 7>}, {transform_indices = @transform_5, window_bounds = array<i64: 2, 7>}]} {
    %c0_i32 = arith.constant 0 : i32
    %0 = arith.cmpi eq, %arg1, %c0_i32 : i32
    %1 = arith.extui %0 : i1 to i32
    %c0_i32_0 = arith.constant 0 : i32
    %2 = arith.cmpi ne, %1, %c0_i32_0 : i32
    scf.if %2 {
      %cst_9 = arith.constant 0.000000e+00 : f32
      %11 = vector.broadcast %cst_9 : f32 to vector<2x32xf32>
      %c0_10 = arith.constant 0 : index
      %c0_11 = arith.constant 0 : index
      %12 = vector.load %arg8[%c0_10, %c0_11] : memref<2x32xf32, #tpu.memory_space<vmem>>, vector<2x32xf32>
      tpu.vector_store %arg8[%c0_10, %c0_11], %11 {strides = array<i32>} : memref<2x32xf32, #tpu.memory_space<vmem>>, vector<2x32xf32>,
    } else {
    }
    %c0 = arith.constant 0 : index
    %c0_1 = arith.constant 0 : index
    %c0_2 = arith.constant 0 : index
    %3 = vector.load %arg2[%c0, %c0_1, %c0_2] : memref<2x256x32xf32, #tpu.memory_space<vmem>>, vector<2x256x32xf32>
    %c0_3 = arith.constant 0 : index
    %c0_4 = arith.constant 0 : index
    %4 = vector.load %arg8[%c0_3, %c0_4] : memref<2x32xf32, #tpu.memory_space<vmem>>, vector<2x32xf32>
    %cst = arith.constant dense<0.000000e+00> : vector<2x32xf32>
    %5 = vector.multi_reduction <add>, %3, %cst [1] : vector<2x256x32xf32> to vector<2x32xf32>
    %6 = arith.addf %4, %5 : vector<2x32xf32>
    %c0_5 = arith.constant 0 : index
    %c0_6 = arith.constant 0 : index
    %7 = vector.load %arg8[%c0_5, %c0_6] : memref<2x32xf32, #tpu.memory_space<vmem>>, vector<2x32xf32>
    tpu.vector_store %arg8[%c0_5, %c0_6], %6 {strides = array<i32>} : memref<2x32xf32, #tpu.memory_space<vmem>>, vector<2x32xf32>,
    %c0_i32_7 = arith.constant 0 : i32
    %8 = arith.cmpi eq, %arg1, %c0_i32_7 : i32
    %9 = arith.extui %8 : i1 to i32
    %c0_i32_8 = arith.constant 0 : i32
    %10 = arith.cmpi ne, %9, %c0_i32_8 : i32
    scf.if %10 {
      %c0_9 = arith.constant 0 : index
      %c0_10 = arith.constant 0 : index
      %11 = vector.load %arg8[%c0_9, %c0_10] : memref<2x32xf32, #tpu.memory_space<vmem>>, vector<2x32xf32>
      %cst_11 = arith.constant 3.906250e-03 : f32
      %12 = vector.broadcast %cst_11 : f32 to vector<2x32xf32>
      %13 = arith.mulf %11, %12 : vector<2x32xf32>
      %c0_12 = arith.constant 0 : index
      %c0_13 = arith.constant 0 : index
      %14 = vector.load %arg3[%c0_12, %c0_13] : memref<32x32xf32, #tpu.memory_space<vmem>>, vector<32x32xf32>
      %cst_14 = arith.constant dense<0.000000e+00> : vector<2x32xf32>
      %15 = tpu.matmul %13, %14, %cst_14 {dimension_numbers = #tpu.dot_dimension_numbers<[1], [0], [0], [1], [0, 0, 1, 1], [], []>} : vector<2x32xf32>, vector<32x32xf32>, vector<2x32xf32> -> vector<2x32xf32>
      %c0_15 = arith.constant 0 : index
      %c0_16 = arith.constant 0 : index
      %16 = vector.load %arg4[%c0_15, %c0_16] : memref<1x32xf32, #tpu.memory_space<vmem>>, vector<1x32xf32>
      %17 = vector.broadcast %16 : vector<1x32xf32> to vector<2x32xf32>
      %18 = arith.addf %15, %17 : vector<2x32xf32>
      %cst_17 = arith.constant 0.000000e+00 : f32
      %19 = vector.broadcast %cst_17 : f32 to vector<2x32xf32>
      %20 = arith.maximumf %18, %19 : vector<2x32xf32>
      %c0_18 = arith.constant 0 : index
      %c0_19 = arith.constant 0 : index
      %21 = vector.load %arg5[%c0_18, %c0_19] : memref<32x7xf32, #tpu.memory_space<vmem>>, vector<32x7xf32>
      %cst_20 = arith.constant dense<0.000000e+00> : vector<2x7xf32>
      %22 = tpu.matmul %20, %21, %cst_20 {dimension_numbers = #tpu.dot_dimension_numbers<[1], [0], [0], [1], [0, 0, 1, 1], [], []>} : vector<2x32xf32>, vector<32x7xf32>, vector<2x7xf32> -> vector<2x7xf32>
      %c0_21 = arith.constant 0 : index
      %c0_22 = arith.constant 0 : index
      %23 = vector.load %arg6[%c0_21, %c0_22] : memref<1x7xf32, #tpu.memory_space<vmem>>, vector<1x7xf32>
      %24 = vector.broadcast %23 : vector<1x7xf32> to vector<2x7xf32>
      %25 = arith.addf %22, %24 : vector<2x7xf32>
      %c0_23 = arith.constant 0 : index
      %c0_24 = arith.constant 0 : index
      %26 = vector.load %arg7[%c0_23, %c0_24] : memref<2x7xf32, #tpu.memory_space<vmem>>, vector<2x7xf32>
      tpu.vector_store %arg7[%c0_23, %c0_24], %25 {strides = array<i32>} : memref<2x7xf32, #tpu.memory_space<vmem>>, vector<2x7xf32>,
    } else {
    }
    return
  }
  func.func @transform_0(%arg0: i32, %arg1: i32) -> (i32, i32, i32) {
    %c0_i32 = arith.constant 0 : i32
    %c0_i32_0 = arith.constant 0 : i32
    return %arg0, %arg1, %c0_i32 : i32, i32, i32
  }
  func.func @transform_1(%arg0: i32, %arg1: i32) -> (i32, i32) {
    %c0_i32 = arith.constant 0 : i32
    %c0_i32_0 = arith.constant 0 : i32
    %c0_i32_1 = arith.constant 0 : i32
    return %c0_i32, %c0_i32_0 : i32, i32
  }
  func.func @transform_2(%arg0: i32, %arg1: i32) -> (i32, i32) {
    %c0_i32 = arith.constant 0 : i32
    %c0_i32_0 = arith.constant 0 : i32
    %c0_i32_1 = arith.constant 0 : i32
    return %c0_i32, %c0_i32_0 : i32, i32
  }
  func.func @transform_3(%arg0: i32, %arg1: i32) -> (i32, i32) {
    %c0_i32 = arith.constant 0 : i32
    %c0_i32_0 = arith.constant 0 : i32
    %c0_i32_1 = arith.constant 0 : i32
    return %c0_i32, %c0_i32_0 : i32, i32
  }
  func.func @transform_4(%arg0: i32, %arg1: i32) -> (i32, i32) {
    %c0_i32 = arith.constant 0 : i32
    %c0_i32_0 = arith.constant 0 : i32
    %c0_i32_1 = arith.constant 0 : i32
    return %c0_i32, %c0_i32_0 : i32, i32
  }
  func.func @transform_5(%arg0: i32, %arg1: i32) -> (i32, i32) {
    %c0_i32 = arith.constant 0 : i32
    %c0_i32_0 = arith.constant 0 : i32
    return %arg0, %c0_i32 : i32, i32
  }
}

</mosaic_0001>

<bundles_post_ra>
// kernel: tpu_custom_call.1
= control target key start
LH: loop header
LB: loop body
LE: loop exit
PB: predicated region body
PF: predicated region fallthrough
CT: control target
= control target key end

     0   :  { %vm25_vm0 = vcmask 254976   ;;  %v505_v3 = vmov 0.0|0.0   ;;  %v506_v6 = vmov 0.0   ;;  %vm92_vm1 = vcmask 261120   ;;  %s845_s0 = inlined_call_operand.vmem [shape: f32[2,256,32], index: 0, kind: input, shape index: {}]   ;;  %s846_s1 = inlined_call_operand.vmem [shape: f32[32,32], index: 1, kind: input, shape index: {}]   ;;  %s847_s2 = inlined_call_operand.vmem [shape: f32[1,32], index: 2, kind: input, shape index: {}]   ;;  %s848_s3 = inlined_call_operand.vmem [shape: f32[32,7], index: 3, kind: input, shape index: {}]   ;;  %s849_s4 = inlined_call_operand.vmem [shape: f32[1,7], index: 4, kind: input, shape index: {}]   ;;  %s850_s5 = inlined_call_operand.hbm [shape: f32[2,7], index: 5, kind: output, shape index: {}]  }
   0x1   :  { %v244_v0 = vld [vmem:[%s846_s1] sm:$0xff]  ;;  %v245_v1 = vld [vmem:[%s846_s1 + $0x8] sm:$0xff]  ;;  %v246_v2 = vld [vmem:[%s846_s1 + $0x10] sm:$0xff]  ;;  %465 = vmatprep.subr.bf16.mxu0 %v505_v3  ;;  %26 = vst.msk [vmem:[#allocation2] sm:$0x3] %vm25_vm0, %v506_v6  ;;  %471 = vmatprep.subr.bf16.mxu1 %v505_v3  ;;  %vm507_vm2 = vmmov 0  }
   0x2   :  { %v466_v4 = vpack.c.bf16 %v245_v1, %v244_v0  ;;  %v247_v5 = vld [vmem:[%s846_s1 + $0x18] sm:$0xff]  ;;  %v27_v7 = vld [vmem:[%s845_s0] sm:$0xff]  ;;  %v28_v8 = vld [vmem:[%s845_s0 + $0x8] sm:$0xff]  ;;  %451 = vmatprep.mubr.msk.f32.mxu0 %vm507_vm2, %v506_v6  ;;  %462 = vmatprep.mubr.msk.f32.mxu1 %vm507_vm2, %v506_v6 }
   0x3   :  { %v29_v9 = vld [vmem:[%s845_s0 + $0x10] sm:$0xff]  ;;  %v30_v10 = vld [vmem:[%s845_s0 + $0x18] sm:$0xff]  ;;  %v93_v11 = vsel %vm92_vm1, %v27_v7, 0.0  ;;  %v94_v12 = vsel %vm92_vm1, %v28_v8, 0.0  ;;  %v469_v13 = vpack.c.bf16 %v247_v5, %v246_v2  ;;  %v31_v14 = vld [vmem:[%s845_s0 + $0x20] sm:$0xff] }
   0x4   :  { %467 = vmatpush3.bf16.msra.mxu0 %v466_v4  ;;  %v95_v15 = vadd.f32 %v94_v12, %v93_v11  ;;  %v96_v16 = vsel %vm92_vm1, %v29_v9, 0.0  ;;  %v98_v17 = vsel %vm92_vm1, %v30_v10, 0.0  ;;  %v32_v18 = vld [vmem:[%s845_s0 + $0x28] sm:$0xff]  ;;  %v100_v20 = vsel %vm92_vm1, %v31_v14, 0.0  ;;  %v33_v21 = vld [vmem:[%s845_s0 + $0x30] sm:$0xff]  ;;  %v34_v24 = vld [vmem:[%s845_s0 + $0x38] sm:$0xff] }
   0x5   :  { %468 = vmatprep.subr.bf16.mxu0 %v505_v3  ;;  %v102_v23 = vsel %vm92_vm1, %v32_v18, 0.0  ;;  %v104_v26 = vsel %vm92_vm1, %v33_v21, 0.0  ;;  %v35_v27 = vld [vmem:[%s845_s0 + $0x40] sm:$0xff]  ;;  %v60_v30 = vld [vmem:[%s845_s0 + $0x108] sm:$0xff]  ;;  %v61_v31 = vld [vmem:[%s845_s0 + $0x110] sm:$0xff]  ;;  %v106_v32 = vsel %vm92_vm1, %v34_v24, 0.0 }
   0x6   :  { %v97_v19 = vadd.f32 %v96_v16, %v95_v15  ;;  %v59_v29 = vld [vmem:[%s845_s0 + $0x100] sm:$0xff]  ;;  %v36_v33 = vld [vmem:[%s845_s0 + $0x48] sm:$0xff]  ;;  %v62_v34 = vld [vmem:[%s845_s0 + $0x118] sm:$0xff]  ;;  %v163_v37 = vsel %vm92_vm1, %v60_v30, 0.0  ;;  %v165_v38 = vsel %vm92_vm1, %v61_v31, 0.0  ;;  %v108_v40 = vsel %vm92_vm1, %v35_v27, 0.0 }
   0x7   :  { %v162_v36 = vsel %vm92_vm1, %v59_v29, 0.0  ;;  %v63_v39 = vld [vmem:[%s845_s0 + $0x120] sm:$0xff]  ;;  %v37_v42 = vld [vmem:[%s845_s0 + $0x50] sm:$0xff]  ;;  %v167_v44 = vsel %vm92_vm1, %v62_v34, 0.0  ;;  %v64_v45 = vld [vmem:[%s845_s0 + $0x128] sm:$0xff]  ;;  %v110_v46 = vsel %vm92_vm1, %v36_v33, 0.0 }
   0x8   :  { %470 = vmatpush3.bf16.msra.mxu0 %v469_v13  ;;  %v99_v22 = vadd.f32 %v98_v17, %v97_v19  ;;  %v164_v41 = vadd.f32 %v163_v37, %v162_v36  ;;  %v38_v48 = vld [vmem:[%s845_s0 + $0x58] sm:$0xff]  ;;  %v169_v50 = vsel %vm92_vm1, %v63_v39, 0.0  ;;  %v65_v51 = vld [vmem:[%s845_s0 + $0x130] sm:$0xff]  ;;  %v112_v52 = vsel %vm92_vm1, %v37_v42, 0.0  ;;  %v39_v54 = vld [vmem:[%s845_s0 + $0x60] sm:$0xff] }
   0x9   :  { %v171_v56 = vsel %vm92_vm1, %v64_v45, 0.0  ;;  %v66_v57 = vld [vmem:[%s845_s0 + $0x138] sm:$0xff]  ;;  %v114_v58 = vsel %vm92_vm1, %v38_v48, 0.0  ;;  %v40_v60 = vld [vmem:[%s845_s0 + $0x68] sm:$0xff]  ;;  %v173_v62 = vsel %vm92_vm1, %v65_v51, 0.0  ;;  %v67_v63 = vld [vmem:[%s845_s0 + $0x140] sm:$0xff] }
   0xa   :  { %v101_v25 = vadd.f32 %v100_v20, %v99_v22  ;;  %v166_v47 = vadd.f32 %v165_v38, %v164_v41  ;;  %v116_v0 = vsel %vm92_vm1, %v39_v54, 0.0  ;;  %v41_v2 = vld [vmem:[%s845_s0 + $0x70] sm:$0xff]  ;;  %v175_v5 = vsel %vm92_vm1, %v66_v57, 0.0  ;;  %v329_v6 = vld [vmem:[%s848_s3] sm:$0xff]  ;;  %v330_v7 = vld [vmem:[%s848_s3 + $0x8] sm:$0xff] }
   0xb   :  { %v68_v8 = vld [vmem:[%s845_s0 + $0x148] sm:$0xff]  ;;  %v118_v9 = vsel %vm92_vm1, %v40_v60, 0.0  ;;  %v472_v11 = vpack.c.bf16 %v330_v7, %v329_v6 }
   0xc   :  { %v103_v28 = vadd.f32 %v102_v23, %v101_v25  ;;  %v168_v53 = vadd.f32 %v167_v44, %v166_v47 }
   0xe   :  { %v105_v35 = vadd.f32 %v104_v26, %v103_v28  ;;  %v170_v59 = vadd.f32 %v169_v50, %v168_v53 }
  0x10   :  { %v107_v43 = vadd.f32 %v106_v32, %v105_v35  ;;  %v172_v1 = vadd.f32 %v171_v56, %v170_v59 }
  0x12   :  { %v109_v49 = vadd.f32 %v108_v40, %v107_v43  ;;  %v174_v10 = vadd.f32 %v173_v62, %v172_v1 }
  0x14   :  { %v111_v55 = vadd.f32 %v110_v46, %v109_v49 }
  0x16   :  { %v113_v61 = vadd.f32 %v112_v52, %v111_v55 }
  0x18   :  { %v115_v4 = vadd.f32 %v114_v58, %v113_v61 }
  0x19   :  { %10 = vsyncpa [#allocation4], 0  ;;  %v42_v12 = vld [vmem:[%s845_s0 + $0x78] sm:$0xff]  ;;  %v177_v14 = vsel %vm92_vm1, %v67_v63, 0.0  ;;  %v69_v15 = vld [vmem:[%s845_s0 + $0x150] sm:$0xff]  ;;  %v120_v16 = vsel %vm92_vm1, %v41_v2, 0.0  ;;  %v176_v17 = vadd.f32 %v175_v5, %v174_v10  ;;  %473 = vmatpush3.bf16.msra.mxu1 %v472_v11 }
  0x1a   :  { %v117_v13 = vadd.f32 %v116_v0, %v115_v4  ;;  %v43_v18 = vld [vmem:[%s845_s0 + $0x80] sm:$0xff]  ;;  %v179_v20 = vsel %vm92_vm1, %v68_v8, 0.0  ;;  %474 = vmatprep.subr.bf16.mxu1 %v505_v3  ;;  %v70_v21 = vld [vmem:[%s845_s0 + $0x158] sm:$0xff]  ;;  %v122_v22 = vsel %vm92_vm1, %v42_v12, 0.0  ;;  %v44_v24 = vld [vmem:[%s845_s0 + $0x88] sm:$0xff]  ;;  %v181_v26 = vsel %vm92_vm1, %v69_v15, 0.0 }
  0x1b   :  { %v178_v23 = vadd.f32 %v177_v14, %v176_v17  ;;  %v71_v27 = vld [vmem:[%s845_s0 + $0x160] sm:$0xff]  ;;  %v124_v3 = vsel %vm92_vm1, %v43_v18, 0.0  ;;  %v45_v29 = vld [vmem:[%s845_s0 + $0x90] sm:$0xff]  ;;  %v183_v31 = vsel %vm92_vm1, %v70_v21, 0.0  ;;  %v72_v32 = vld [vmem:[%s845_s0 + $0x168] sm:$0xff]  ;;  %v126_v33 = vsel %vm92_vm1, %v44_v24, 0.0 }
  0x1c   :  { %v119_v19 = vadd.f32 %v118_v9, %v117_v13  ;;  %v46_v35 = vld [vmem:[%s845_s0 + $0x98] sm:$0xff]  ;;  %v185_v37 = vsel %vm92_vm1, %v71_v27, 0.0  ;;  %v73_v38 = vld [vmem:[%s845_s0 + $0x170] sm:$0xff]  ;;  %v128_v39 = vsel %vm92_vm1, %v45_v29, 0.0  ;;  %v47_v41 = vld [vmem:[%s845_s0 + $0xa0] sm:$0xff]  ;;  %v187_v43 = vsel %vm92_vm1, %v72_v32, 0.0 }
  0x1d   :  { %v180_v28 = vadd.f32 %v179_v20, %v178_v23  ;;  %v74_v44 = vld [vmem:[%s845_s0 + $0x178] sm:$0xff]  ;;  %v130_v45 = vsel %vm92_vm1, %v46_v35, 0.0  ;;  %v48_v47 = vld [vmem:[%s845_s0 + $0xa8] sm:$0xff]  ;;  %v189_v49 = vsel %vm92_vm1, %v73_v38, 0.0  ;;  %v75_v50 = vld [vmem:[%s845_s0 + $0x180] sm:$0xff]  ;;  %v132_v51 = vsel %vm92_vm1, %v47_v41, 0.0 }
  0x1e   :  { %v121_v25 = vadd.f32 %v120_v16, %v119_v19  ;;  %v49_v53 = vld [vmem:[%s845_s0 + $0xb0] sm:$0xff]  ;;  %v191_v55 = vsel %vm92_vm1, %v74_v44, 0.0  ;;  %v76_v56 = vld [vmem:[%s845_s0 + $0x188] sm:$0xff]  ;;  %v134_v57 = vsel %vm92_vm1, %v48_v47, 0.0  ;;  %v50_v59 = vld [vmem:[%s845_s0 + $0xb8] sm:$0xff]  ;;  %v193_v61 = vsel %vm92_vm1, %v75_v50, 0.0 }
  0x1f   :  { %v182_v34 = vadd.f32 %v181_v26, %v180_v28  ;;  %v77_v62 = vld [vmem:[%s845_s0 + $0x190] sm:$0xff]  ;;  %v136_v63 = vsel %vm92_vm1, %v49_v53, 0.0  ;;  %v51_v1 = vld [vmem:[%s845_s0 + $0xc0] sm:$0xff]  ;;  %v195_v4 = vsel %vm92_vm1, %v76_v56, 0.0  ;;  %v78_v5 = vld [vmem:[%s845_s0 + $0x198] sm:$0xff]  ;;  %v138_v6 = vsel %vm92_vm1, %v50_v59, 0.0 }
  0x20   :  { %v123_v30 = vadd.f32 %v122_v22, %v121_v25  ;;  %v52_v8 = vld [vmem:[%s845_s0 + $0xc8] sm:$0xff]  ;;  %v197_v10 = vsel %vm92_vm1, %v77_v62, 0.0  ;;  %v79_v11 = vld [vmem:[%s845_s0 + $0x1a0] sm:$0xff]  ;;  %v140_v12 = vsel %vm92_vm1, %v51_v1, 0.0  ;;  %v53_v14 = vld [vmem:[%s845_s0 + $0xd0] sm:$0xff]  ;;  %v199_v16 = vsel %vm92_vm1, %v78_v5, 0.0 }
  0x21   :  { %v184_v40 = vadd.f32 %v183_v31, %v182_v34  ;;  %v80_v17 = vld [vmem:[%s845_s0 + $0x1a8] sm:$0xff]  ;;  %v142_v18 = vsel %vm92_vm1, %v52_v8, 0.0  ;;  %v54_v20 = vld [vmem:[%s845_s0 + $0xd8] sm:$0xff]  ;;  %v201_v22 = vsel %vm92_vm1, %v79_v11, 0.0  ;;  %v81_v23 = vld [vmem:[%s845_s0 + $0x1b0] sm:$0xff]  ;;  %v144_v24 = vsel %vm92_vm1, %v53_v14, 0.0 }
  0x22   :  { %v125_v36 = vadd.f32 %v124_v3, %v123_v30  ;;  %v55_v26 = vld [vmem:[%s845_s0 + $0xe0] sm:$0xff]  ;;  %v203_v3 = vsel %vm92_vm1, %v80_v17, 0.0  ;;  %v82_v28 = vld [vmem:[%s845_s0 + $0x1b8] sm:$0xff]  ;;  %v146_v29 = vsel %vm92_vm1, %v54_v20, 0.0  ;;  %v56_v31 = vld [vmem:[%s845_s0 + $0xe8] sm:$0xff]  ;;  %vm233_vm3 = vcmask 1041409  }
  0x23   :  { %v186_v46 = vadd.f32 %v185_v37, %v184_v40  ;;  %v83_v34 = vld [vmem:[%s845_s0 + $0x1c0] sm:$0xff]  ;;  %v148_v35 = vsel %vm92_vm1, %v55_v26, 0.0  ;;  %v57_v37 = vld [vmem:[%s845_s0 + $0xf0] sm:$0xff]  ;;  %v84_v40 = vld [vmem:[%s845_s0 + $0x1c8] sm:$0xff]  ;;  %v150_v41 = vsel %vm92_vm1, %v56_v31, 0.0  ;;  %s508_s9 = smov [#allocation3]  }
  0x24   :  { %v127_v42 = vadd.f32 %v126_v33, %v125_v36  ;;  %v205_v33 = vsel %vm92_vm1, %v81_v23, 0.0  ;;  %v152_v47 = vsel %vm92_vm1, %v57_v37, 0.0  ;;  %v211_v50 = vsel %vm92_vm1, %v84_v40, 0.0  ;;  %v87_v56 = vld [vmem:[%s845_s0 + $0x1e0] sm:$0xff]  ;;  %s421_s10 = sshll.u32 %s508_s9, 4  ;;  %s422_s10 = int_to_ptr.vmem [resolvable:$true] %s421_s10 }
  0x25   :  { %v188_v52 = vadd.f32 %v187_v43, %v186_v46  ;;  %v58_v43 = vld [vmem:[%s845_s0 + $0xf8] sm:$0xff]  ;;  %v85_v46 = vld [vmem:[%s845_s0 + $0x1d0] sm:$0xff]  ;;  %vm413_vm4 = vcmask 50176   ;;  %p486_p1 = scmp.lt.s32.totalorder %s422_s10, %s422_s10 }
  0x26   :  { %v129_v48 = vadd.f32 %v128_v39, %v127_v42  ;;  %v207_v39 = vsel %vm92_vm1, %v82_v28, 0.0 }
  0x27   :  { %v190_v58 = vadd.f32 %v189_v49, %v188_v52  ;;  %v154_v52 = vsel %vm92_vm1, %v58_v43, 0.0 }
  0x28   :  { %v131_v54 = vadd.f32 %v130_v45, %v129_v48  ;;  %v209_v45 = vsel %vm92_vm1, %v83_v34, 0.0  ;;  %v431_v34 = vld [vmem:[%s849_s4] ss:$0 sm:$0xff] }
  0x29   :  { %v192_v0 = vadd.f32 %v191_v55, %v190_v58  ;;  %v213_v55 = vsel %vm92_vm1, %v85_v46, 0.0 }
  0x2a   :  { %v133_v60 = vadd.f32 %v132_v51, %v131_v54  ;;  %v86_v51 = vld [vmem:[%s845_s0 + $0x1d8] sm:$0xff] }
  0x2b   :  { %v194_v7 = vadd.f32 %v193_v61, %v192_v0  ;;  %v215_v59 = vsel %vm92_vm1, %v86_v51, 0.0  ;;  %v89_v0 = vld [vmem:[%s845_s0 + $0x1f0] sm:$0xff] }
  0x2c   :  { %v135_v2 = vadd.f32 %v134_v57, %v133_v60  ;;  %v88_v60 = vld [vmem:[%s845_s0 + $0x1e8] sm:$0xff] }
  0x2d   :  { %v196_v13 = vadd.f32 %v195_v4, %v194_v7  ;;  %v90_v4 = vld [vmem:[%s845_s0 + $0x1f8] sm:$0xff]  ;;  %v221_v7 = vsel %vm92_vm1, %v89_v0, 0.0 }
  0x2e   :  { %v137_v9 = vadd.f32 %v136_v63, %v135_v2  ;;  %v217_v63 = vsel %vm92_vm1, %v87_v56, 0.0  ;;  %v219_v2 = vsel %vm92_vm1, %v88_v60, 0.0 }
  0x2f   :  { %v198_v19 = vadd.f32 %v197_v10, %v196_v13 }
  0x30   :  { %v139_v15 = vadd.f32 %v138_v6, %v137_v9  ;;  %v223_v9 = vsel %vm92_vm1, %v90_v4, 0.0 }
  0x31   :  { %v200_v25 = vadd.f32 %v199_v16, %v198_v19 }
  0x32   :  { %v141_v21 = vadd.f32 %v140_v12, %v139_v15 }
  0x33   :  { %v202_v30 = vadd.f32 %v201_v22, %v200_v25 }
  0x34   :  { %v143_v27 = vadd.f32 %v142_v18, %v141_v21  ;;  %v91_v21 = vld [vmem:[#allocation2] sm:$0x3] }
  0x35   :  { %v204_v36 = vadd.f32 %v203_v3, %v202_v30  ;;  %v332_v3 = vld [vmem:[%s848_s3 + $0x18] sm:$0xff] }
  0x36   :  { %v145_v32 = vadd.f32 %v144_v24, %v143_v27  ;;  %v331_v27 = vld [vmem:[%s848_s3 + $0x10] sm:$0xff]  ;;  %s481_s3 = scalar_lea.vmem %s422_s10, 32 }
  0x37   :  { %v206_v42 = vadd.f32 %v205_v33, %v204_v36  ;;  %v475_v28 = vpack.c.bf16 %v332_v3, %v331_v27  ;;  %p482_p0 = scmp.ne.s32.totalorder %s422_s10, %s481_s3  ;;  %p487_p2 = scmp.lt.s32.totalorder %s481_s3, %s481_s3 }
  0x38   :  { %v147_v38 = vadd.f32 %v146_v29, %v145_v32  ;;  %v429_v29 = vld [vmem:[%s847_s2] ss:$0 sm:$0xff] }
  0x39   :  { %v208_v48 = vadd.f32 %v207_v39, %v206_v42  ;;  %476 = vmatpush3.bf16.msra.mxu1 %v475_v28  ;;  %p488_p3 = por %p487_p2, %p486_p1 }
  0x3a   :  { %v149_v44 = vadd.f32 %v148_v35, %v147_v38 }
  0x3b   :  { %v210_v53 = vadd.f32 %v209_v45, %v208_v48  ;;  %p489_p4 = pnand %p488_p3, %p482_p0 }
  0x3c   :  { %v151_v49 = vadd.f32 %v150_v41, %v149_v44 }
  0x3d   :  { %v212_v57 = vadd.f32 %v211_v50, %v210_v53 }
  0x3e   :  { %v153_v54 = vadd.f32 %v152_v47, %v151_v49 }
  0x3f   :  { %v214_v61 = vadd.f32 %v213_v55, %v212_v57 }
  0x40   :  { %v155_v58 = vadd.f32 %v154_v52, %v153_v54 }
  0x41   :  { %v216_v1 = vadd.f32 %v215_v59, %v214_v61 }
  0x42   :  { %v156_v62 = vrot.slane %v155_v58, 4 }
  0x43   :  { %v218_v6 = vadd.f32 %v217_v63, %v216_v1 }
  0x44   :  { %v157_v5 = vadd.f32 %v156_v62, %v155_v58 }
  0x45   :  { %v220_v8 = vadd.f32 %v219_v2, %v218_v6 }
  0x46   :  { %v158_v10 = vrot.slane %v157_v5, 2 }
  0x47   :  { %v222_v11 = vadd.f32 %v221_v7, %v220_v8 }
  0x48   :  { %v159_v13 = vadd.f32 %v158_v10, %v157_v5 }
  0x49   :  { %v224_v12 = vadd.f32 %v223_v9, %v222_v11 }
  0x4a   :  { %v160_v16 = vrot.slane %v159_v13, 1 }
  0x4b   :  { %v225_v14 = vrot.slane %v224_v12, 4 }
  0x4c   :  { %v161_v19 = vadd.f32 %v160_v16, %v159_v13 }
  0x4d   :  { %v226_v15 = vadd.f32 %v225_v14, %v224_v12 }
  0x4f   :  { %v227_v17 = vrot.slane %v226_v15, 2 }
  0x51   :  { %v228_v18 = vadd.f32 %v227_v17, %v226_v15 }
  0x53   :  { %v229_v20 = vrot.slane %v228_v18, 1 }
  0x55   :  { %v230_v22 = vadd.f32 %v229_v20, %v228_v18 }
  0x57   :  { %v234_v23 = vsel %vm233_vm3, %v230_v22, %v161_v19 }
  0x58   :  { %v236_v24 = vadd.f32 %v234_v23, %v91_v21 }
  0x5a   :  { %238 = vst.msk [vmem:[#allocation2] sm:$0x3] %vm25_vm0, %v236_v24 }
  0x61   :  { %v242_v25 = vld [vmem:[#allocation2] sm:$0x3] }
  0x62   :  { %v243_v26 = vmul.f32 0.00390625, %v242_v25 }
  0x64   :  { %452 = vmatmul.mubr.msk.f32.vlgmr.msra.gmra.mrb[0].mxu0 %vm92_vm1, %v243_v26 }
 0x137   :  { %v324_v30 = vpop.f32.mrb[0].mxu0 }
 0x138   :  { %v325_v31 = vadd.f32 %v429_v29, %v324_v30  ;;  %v453_v32 = vpop.f32.mrb[1].mxu0 }
 0x13a   :  { %v328_v33 = vmax.f32 %v325_v31, 0.0 }
 0x13c   :  { %463 = vmatmul.mubr.msk.f32.vlgmr.msra.gmra.mrb[0].mxu1 %vm92_vm1, %v328_v33 }
 0x20f   :  { %v409_v35 = vpop.f32.mrb[0].mxu1 }
 0x210   :  { %v410_v36 = vadd.f32 %v431_v34, %v409_v35  ;;  %v464_v37 = vpop.f32.mrb[1].mxu1 }
 0x212   :  { %414 = vst.msk [vmem:[#allocation3] sm:$0x3] %vm413_vm4, %v410_v36 }
 0x213   :  { %492 = shalt.err (!%p489_p4)
}
 0x214   :  { %s493_s12 = scalar_lea.hbm %s850_s5, 32 }
 0x215   :  { %p494_p5 = scmp.ne.s32.totalorder %s850_s5, %s493_s12  ;;  %p497_p6 = scmp.lt.u32.totalorder %s493_s12, %s850_s5 }
 0x217   :  { %p499_p7 = pnand %p497_p6, %p494_p5 }
 0x219   :  { %502 = shalt.err (!%p499_p7)
}
 0x21a   :  { %424 = dma.vmem_to_hbm [thread:$0]  %s422_s10, 32, %s850_s5, [#allocation4]  }
 0x21b   :  { %503 = dma.done.wait [#allocation4], 32  }
 0x21c   :  { %504 = vsyncadd [#allocation4], 4294967264 }
 0x21d   :  { %428 = vsyncpa [#allocation4], 1 }

// kernel: tpu_custom_call.1
= control target key start
LH: loop header
LB: loop body
LE: loop exit
PB: predicated region body
PF: predicated region fallthrough
CT: control target
= control target key end

     0   :  { %vm25_vm0 = vcmask 254976   ;;  %v505_v3 = vmov 0.0|0.0   ;;  %v506_v6 = vmov 0.0   ;;  %vm92_vm1 = vcmask 261120   ;;  %s845_s0 = inlined_call_operand.vmem [shape: f32[2,256,32], index: 0, kind: input, shape index: {}]   ;;  %s846_s1 = inlined_call_operand.vmem [shape: f32[32,32], index: 1, kind: input, shape index: {}]   ;;  %s847_s2 = inlined_call_operand.vmem [shape: f32[1,32], index: 2, kind: input, shape index: {}]   ;;  %s848_s3 = inlined_call_operand.vmem [shape: f32[32,7], index: 3, kind: input, shape index: {}]   ;;  %s849_s4 = inlined_call_operand.vmem [shape: f32[1,7], index: 4, kind: input, shape index: {}]   ;;  %s850_s5 = inlined_call_operand.hbm [shape: f32[2,7], index: 5, kind: output, shape index: {}]  }
   0x1   :  { %v244_v0 = vld [vmem:[%s846_s1] sm:$0xff]  ;;  %v245_v1 = vld [vmem:[%s846_s1 + $0x8] sm:$0xff]  ;;  %v246_v2 = vld [vmem:[%s846_s1 + $0x10] sm:$0xff]  ;;  %465 = vmatprep.subr.bf16.mxu0 %v505_v3  ;;  %26 = vst.msk [vmem:[#allocation2] sm:$0x3] %vm25_vm0, %v506_v6  ;;  %471 = vmatprep.subr.bf16.mxu1 %v505_v3  ;;  %vm507_vm2 = vmmov 0  }
   0x2   :  { %v466_v4 = vpack.c.bf16 %v245_v1, %v244_v0  ;;  %v247_v5 = vld [vmem:[%s846_s1 + $0x18] sm:$0xff]  ;;  %v27_v7 = vld [vmem:[%s845_s0] sm:$0xff]  ;;  %v28_v8 = vld [vmem:[%s845_s0 + $0x8] sm:$0xff]  ;;  %451 = vmatprep.mubr.msk.f32.mxu0 %vm507_vm2, %v506_v6  ;;  %462 = vmatprep.mubr.msk.f32.mxu1 %vm507_vm2, %v506_v6 }
   0x3   :  { %v29_v9 = vld [vmem:[%s845_s0 + $0x10] sm:$0xff]  ;;  %v30_v10 = vld [vmem:[%s845_s0 + $0x18] sm:$0xff]  ;;  %v93_v11 = vsel %vm92_vm1, %v27_v7, 0.0  ;;  %v94_v12 = vsel %vm92_vm1, %v28_v8, 0.0  ;;  %v469_v13 = vpack.c.bf16 %v247_v5, %v246_v2  ;;  %v31_v14 = vld [vmem:[%s845_s0 + $0x20] sm:$0xff] }
   0x4   :  { %467 = vmatpush3.bf16.msra.mxu0 %v466_v4  ;;  %v95_v15 = vadd.f32 %v94_v12, %v93_v11  ;;  %v96_v16 = vsel %vm92_vm1, %v29_v9, 0.0  ;;  %v98_v17 = vsel %vm92_vm1, %v30_v10, 0.0  ;;  %v32_v18 = vld [vmem:[%s845_s0 + $0x28] sm:$0xff]  ;;  %v100_v20 = vsel %vm92_vm1, %v31_v14, 0.0  ;;  %v33_v21 = vld [vmem:[%s845_s0 + $0x30] sm:$0xff]  ;;  %v34_v24 = vld [vmem:[%s845_s0 + $0x38] sm:$0xff] }
   0x5   :  { %468 = vmatprep.subr.bf16.mxu0 %v505_v3  ;;  %v102_v23 = vsel %vm92_vm1, %v32_v18, 0.0  ;;  %v104_v26 = vsel %vm92_vm1, %v33_v21, 0.0  ;;  %v35_v27 = vld [vmem:[%s845_s0 + $0x40] sm:$0xff]  ;;  %v60_v30 = vld [vmem:[%s845_s0 + $0x108] sm:$0xff]  ;;  %v61_v31 = vld [vmem:[%s845_s0 + $0x110] sm:$0xff]  ;;  %v106_v32 = vsel %vm92_vm1, %v34_v24, 0.0 }
   0x6   :  { %v97_v19 = vadd.f32 %v96_v16, %v95_v15  ;;  %v59_v29 = vld [vmem:[%s845_s0 + $0x100] sm:$0xff]  ;;  %v36_v33 = vld [vmem:[%s845_s0 + $0x48] sm:$0xff]  ;;  %v62_v34 = vld [vmem:[%s845_s0 + $0x118] sm:$0xff]  ;;  %v163_v37 = vsel %vm92_vm1, %v60_v30, 0.0  ;;  %v165_v38 = vsel %vm92_vm1, %v61_v31, 0.0  ;;  %v108_v40 = vsel %vm92_vm1, %v35_v27, 0.0 }
   0x7   :  { %v162_v36 = vsel %vm92_vm1, %v59_v29, 0.0  ;;  %v63_v39 = vld [vmem:[%s845_s0 + $0x120] sm:$0xff]  ;;  %v37_v42 = vld [vmem:[%s845_s0 + $0x50] sm:$0xff]  ;;  %v167_v44 = vsel %vm92_vm1, %v62_v34, 0.0  ;;  %v64_v45 = vld [vmem:[%s845_s0 + $0x128] sm:$0xff]  ;;  %v110_v46 = vsel %vm92_vm1, %v36_v33, 0.0 }
   0x8   :  { %470 = vmatpush3.bf16.msra.mxu0 %v469_v13  ;;  %v99_v22 = vadd.f32 %v98_v17, %v97_v19  ;;  %v164_v41 = vadd.f32 %v163_v37, %v162_v36  ;;  %v38_v48 = vld [vmem:[%s845_s0 + $0x58] sm:$0xff]  ;;  %v169_v50 = vsel %vm92_vm1, %v63_v39, 0.0  ;;  %v65_v51 = vld [vmem:[%s845_s0 + $0x130] sm:$0xff]  ;;  %v112_v52 = vsel %vm92_vm1, %v37_v42, 0.0  ;;  %v39_v54 = vld [vmem:[%s845_s0 + $0x60] sm:$0xff] }
   0x9   :  { %v171_v56 = vsel %vm92_vm1, %v64_v45, 0.0  ;;  %v66_v57 = vld [vmem:[%s845_s0 + $0x138] sm:$0xff]  ;;  %v114_v58 = vsel %vm92_vm1, %v38_v48, 0.0  ;;  %v40_v60 = vld [vmem:[%s845_s0 + $0x68] sm:$0xff]  ;;  %v173_v62 = vsel %vm92_vm1, %v65_v51, 0.0  ;;  %v67_v63 = vld [vmem:[%s845_s0 + $0x140] sm:$0xff] }
   0xa   :  { %v101_v25 = vadd.f32 %v100_v20, %v99_v22  ;;  %v166_v47 = vadd.f32 %v165_v38, %v164_v41  ;;  %v116_v0 = vsel %vm92_vm1, %v39_v54, 0.0  ;;  %v41_v2 = vld [vmem:[%s845_s0 + $0x70] sm:$0xff]  ;;  %v175_v5 = vsel %vm92_vm1, %v66_v57, 0.0  ;;  %v329_v6 = vld [vmem:[%s848_s3] sm:$0xff]  ;;  %v330_v7 = vld [vmem:[%s848_s3 + $0x8] sm:$0xff] }
   0xb   :  { %v68_v8 = vld [vmem:[%s845_s0 + $0x148] sm:$0xff]  ;;  %v118_v9 = vsel %vm92_vm1, %v40_v60, 0.0  ;;  %v472_v11 = vpack.c.bf16 %v330_v7, %v329_v6 }
   0xc   :  { %v103_v28 = vadd.f32 %v102_v23, %v101_v25  ;;  %v168_v53 = vadd.f32 %v167_v44, %v166_v47 }
   0xe   :  { %v105_v35 = vadd.f32 %v104_v26, %v103_v28  ;;  %v170_v59 = vadd.f32 %v169_v50, %v168_v53 }
  0x10   :  { %v107_v43 = vadd.f32 %v106_v32, %v105_v35  ;;  %v172_v1 = vadd.f32 %v171_v56, %v170_v59 }
  0x12   :  { %v109_v49 = vadd.f32 %v108_v40, %v107_v43  ;;  %v174_v10 = vadd.f32 %v173_v62, %v172_v1 }
  0x14   :  { %v111_v55 = vadd.f32 %v110_v46, %v109_v49 }
  0x16   :  { %v113_v61 = vadd.f32 %v112_v52, %v111_v55 }
  0x18   :  { %v115_v4 = vadd.f32 %v114_v58, %v113_v61 }
  0x19   :  { %10 = vsyncpa [#allocation4], 0  ;;  %v42_v12 = vld [vmem:[%s845_s0 + $0x78] sm:$0xff]  ;;  %v177_v14 = vsel %vm92_vm1, %v67_v63, 0.0  ;;  %v69_v15 = vld [vmem:[%s845_s0 + $0x150] sm:$0xff]  ;;  %v120_v16 = vsel %vm92_vm1, %v41_v2, 0.0  ;;  %v176_v17 = vadd.f32 %v175_v5, %v174_v10  ;;  %473 = vmatpush3.bf16.msra.mxu1 %v472_v11 }
  0x1a   :  { %v117_v13 = vadd.f32 %v116_v0, %v115_v4  ;;  %v43_v18 = vld [vmem:[%s845_s0 + $0x80] sm:$0xff]  ;;  %v179_v20 = vsel %vm92_vm1, %v68_v8, 0.0  ;;  %474 = vmatprep.subr.bf16.mxu1 %v505_v3  ;;  %v70_v21 = vld [vmem:[%s845_s0 + $0x158] sm:$0xff]  ;;  %v122_v22 = vsel %vm92_vm1, %v42_v12, 0.0  ;;  %v44_v24 = vld [vmem:[%s845_s0 + $0x88] sm:$0xff]  ;;  %v181_v26 = vsel %vm92_vm1, %v69_v15, 0.0 }
  0x1b   :  { %v178_v23 = vadd.f32 %v177_v14, %v176_v17  ;;  %v71_v27 = vld [vmem:[%s845_s0 + $0x160] sm:$0xff]  ;;  %v124_v3 = vsel %vm92_vm1, %v43_v18, 0.0  ;;  %v45_v29 = vld [vmem:[%s845_s0 + $0x90] sm:$0xff]  ;;  %v183_v31 = vsel %vm92_vm1, %v70_v21, 0.0  ;;  %v72_v32 = vld [vmem:[%s845_s0 + $0x168] sm:$0xff]  ;;  %v126_v33 = vsel %vm92_vm1, %v44_v24, 0.0 }
  0x1c   :  { %v119_v19 = vadd.f32 %v118_v9, %v117_v13  ;;  %v46_v35 = vld [vmem:[%s845_s0 + $0x98] sm:$0xff]  ;;  %v185_v37 = vsel %vm92_vm1, %v71_v27, 0.0  ;;  %v73_v38 = vld [vmem:[%s845_s0 + $0x170] sm:$0xff]  ;;  %v128_v39 = vsel %vm92_vm1, %v45_v29, 0.0  ;;  %v47_v41 = vld [vmem:[%s845_s0 + $0xa0] sm:$0xff]  ;;  %v187_v43 = vsel %vm92_vm1, %v72_v32, 0.0 }
  0x1d   :  { %v180_v28 = vadd.f32 %v179_v20, %v178_v23  ;;  %v74_v44 = vld [vmem:[%s845_s0 + $0x178] sm:$0xff]  ;;  %v130_v45 = vsel %vm92_vm1, %v46_v35, 0.0  ;;  %v48_v47 = vld [vmem:[%s845_s0 + $0xa8] sm:$0xff]  ;;  %v189_v49 = vsel %vm92_vm1, %v73_v38, 0.0  ;;  %v75_v50 = vld [vmem:[%s845_s0 + $0x180] sm:$0xff]  ;;  %v132_v51 = vsel %vm92_vm1, %v47_v41, 0.0 }
  0x1e   :  { %v121_v25 = vadd.f32 %v120_v16, %v119_v19  ;;  %v49_v53 = vld [vmem:[%s845_s0 + $0xb0] sm:$0xff]  ;;  %v191_v55 = vsel %vm92_vm1, %v74_v44, 0.0  ;;  %v76_v56 = vld [vmem:[%s845_s0 + $0x188] sm:$0xff]  ;;  %v134_v57 = vsel %vm92_vm1, %v48_v47, 0.0  ;;  %v50_v59 = vld [vmem:[%s845_s0 + $0xb8] sm:$0xff]  ;;  %v193_v61 = vsel %vm92_vm1, %v75_v50, 0.0 }
  0x1f   :  { %v182_v34 = vadd.f32 %v181_v26, %v180_v28  ;;  %v77_v62 = vld [vmem:[%s845_s0 + $0x190] sm:$0xff]  ;;  %v136_v63 = vsel %vm92_vm1, %v49_v53, 0.0  ;;  %v51_v1 = vld [vmem:[%s845_s0 + $0xc0] sm:$0xff]  ;;  %v195_v4 = vsel %vm92_vm1, %v76_v56, 0.0  ;;  %v78_v5 = vld [vmem:[%s845_s0 + $0x198] sm:$0xff]  ;;  %v138_v6 = vsel %vm92_vm1, %v50_v59, 0.0 }
  0x20   :  { %v123_v30 = vadd.f32 %v122_v22, %v121_v25  ;;  %v52_v8 = vld [vmem:[%s845_s0 + $0xc8] sm:$0xff]  ;;  %v197_v10 = vsel %vm92_vm1, %v77_v62, 0.0  ;;  %v79_v11 = vld [vmem:[%s845_s0 + $0x1a0] sm:$0xff]  ;;  %v140_v12 = vsel %vm92_vm1, %v51_v1, 0.0  ;;  %v53_v14 = vld [vmem:[%s845_s0 + $0xd0] sm:$0xff]  ;;  %v199_v16 = vsel %vm92_vm1, %v78_v5, 0.0 }
  0x21   :  { %v184_v40 = vadd.f32 %v183_v31, %v182_v34  ;;  %v80_v17 = vld [vmem:[%s845_s0 + $0x1a8] sm:$0xff]  ;;  %v142_v18 = vsel %vm92_vm1, %v52_v8, 0.0  ;;  %v54_v20 = vld [vmem:[%s845_s0 + $0xd8] sm:$0xff]  ;;  %v201_v22 = vsel %vm92_vm1, %v79_v11, 0.0  ;;  %v81_v23 = vld [vmem:[%s845_s0 + $0x1b0] sm:$0xff]  ;;  %v144_v24 = vsel %vm92_vm1, %v53_v14, 0.0 }
  0x22   :  { %v125_v36 = vadd.f32 %v124_v3, %v123_v30  ;;  %v55_v26 = vld [vmem:[%s845_s0 + $0xe0] sm:$0xff]  ;;  %v203_v3 = vsel %vm92_vm1, %v80_v17, 0.0  ;;  %v82_v28 = vld [vmem:[%s845_s0 + $0x1b8] sm:$0xff]  ;;  %v146_v29 = vsel %vm92_vm1, %v54_v20, 0.0  ;;  %v56_v31 = vld [vmem:[%s845_s0 + $0xe8] sm:$0xff]  ;;  %vm233_vm3 = vcmask 1041409  }
  0x23   :  { %v186_v46 = vadd.f32 %v185_v37, %v184_v40  ;;  %v83_v34 = vld [vmem:[%s845_s0 + $0x1c0] sm:$0xff]  ;;  %v148_v35 = vsel %vm92_vm1, %v55_v26, 0.0  ;;  %v57_v37 = vld [vmem:[%s845_s0 + $0xf0] sm:$0xff]  ;;  %v84_v40 = vld [vmem:[%s845_s0 + $0x1c8] sm:$0xff]  ;;  %v150_v41 = vsel %vm92_vm1, %v56_v31, 0.0  ;;  %s508_s9 = smov [#allocation3]  }
  0x24   :  { %v127_v42 = vadd.f32 %v126_v33, %v125_v36  ;;  %v205_v33 = vsel %vm92_vm1, %v81_v23, 0.0  ;;  %v152_v47 = vsel %vm92_vm1, %v57_v37, 0.0  ;;  %v211_v50 = vsel %vm92_vm1, %v84_v40, 0.0  ;;  %v87_v56 = vld [vmem:[%s845_s0 + $0x1e0] sm:$0xff]  ;;  %s421_s10 = sshll.u32 %s508_s9, 4  ;;  %s422_s10 = int_to_ptr.vmem [resolvable:$true] %s421_s10 }
  0x25   :  { %v188_v52 = vadd.f32 %v187_v43, %v186_v46  ;;  %v58_v43 = vld [vmem:[%s845_s0 + $0xf8] sm:$0xff]  ;;  %v85_v46 = vld [vmem:[%s845_s0 + $0x1d0] sm:$0xff]  ;;  %vm413_vm4 = vcmask 50176   ;;  %p486_p1 = scmp.lt.s32.totalorder %s422_s10, %s422_s10 }
  0x26   :  { %v129_v48 = vadd.f32 %v128_v39, %v127_v42  ;;  %v207_v39 = vsel %vm92_vm1, %v82_v28, 0.0 }
  0x27   :  { %v190_v58 = vadd.f32 %v189_v49, %v188_v52  ;;  %v154_v52 = vsel %vm92_vm1, %v58_v43, 0.0 }
  0x28   :  { %v131_v54 = vadd.f32 %v130_v45, %v129_v48  ;;  %v209_v45 = vsel %vm92_vm1, %v83_v34, 0.0  ;;  %v431_v34 = vld [vmem:[%s849_s4] ss:$0 sm:$0xff] }
  0x29   :  { %v192_v0 = vadd.f32 %v191_v55, %v190_v58  ;;  %v213_v55 = vsel %vm92_vm1, %v85_v46, 0.0 }
  0x2a   :  { %v133_v60 = vadd.f32 %v132_v51, %v131_v54  ;;  %v86_v51 = vld [vmem:[%s845_s0 + $0x1d8] sm:$0xff] }
  0x2b   :  { %v194_v7 = vadd.f32 %v193_v61, %v192_v0  ;;  %v215_v59 = vsel %vm92_vm1, %v86_v51, 0.0  ;;  %v89_v0 = vld [vmem:[%s845_s0 + $0x1f0] sm:$0xff] }
  0x2c   :  { %v135_v2 = vadd.f32 %v134_v57, %v133_v60  ;;  %v88_v60 = vld [vmem:[%s845_s0 + $0x1e8] sm:$0xff] }
  0x2d   :  { %v196_v13 = vadd.f32 %v195_v4, %v194_v7  ;;  %v90_v4 = vld [vmem:[%s845_s0 + $0x1f8] sm:$0xff]  ;;  %v221_v7 = vsel %vm92_vm1, %v89_v0, 0.0 }
  0x2e   :  { %v137_v9 = vadd.f32 %v136_v63, %v135_v2  ;;  %v217_v63 = vsel %vm92_vm1, %v87_v56, 0.0  ;;  %v219_v2 = vsel %vm92_vm1, %v88_v60, 0.0 }
  0x2f   :  { %v198_v19 = vadd.f32 %v197_v10, %v196_v13 }
  0x30   :  { %v139_v15 = vadd.f32 %v138_v6, %v137_v9  ;;  %v223_v9 = vsel %vm92_vm1, %v90_v4, 0.0 }
  0x31   :  { %v200_v25 = vadd.f32 %v199_v16, %v198_v19 }
  0x32   :  { %v141_v21 = vadd.f32 %v140_v12, %v139_v15 }
  0x33   :  { %v202_v30 = vadd.f32 %v201_v22, %v200_v25 }
  0x34   :  { %v143_v27 = vadd.f32 %v142_v18, %v141_v21  ;;  %v91_v21 = vld [vmem:[#allocation2] sm:$0x3] }
  0x35   :  { %v204_v36 = vadd.f32 %v203_v3, %v202_v30  ;;  %v332_v3 = vld [vmem:[%s848_s3 + $0x18] sm:$0xff] }
  0x36   :  { %v145_v32 = vadd.f32 %v144_v24, %v143_v27  ;;  %v331_v27 = vld [vmem:[%s848_s3 + $0x10] sm:$0xff]  ;;  %s481_s3 = scalar_lea.vmem %s422_s10, 32 }
  0x37   :  { %v206_v42 = vadd.f32 %v205_v33, %v204_v36  ;;  %v475_v28 = vpack.c.bf16 %v332_v3, %v331_v27  ;;  %p482_p0 = scmp.ne.s32.totalorder %s422_s10, %s481_s3  ;;  %p487_p2 = scmp.lt.s32.totalorder %s481_s3, %s481_s3 }
  0x38   :  { %v147_v38 = vadd.f32 %v146_v29, %v145_v32  ;;  %v429_v29 = vld [vmem:[%s847_s2] ss:$0 sm:$0xff] }
  0x39   :  { %v208_v48 = vadd.f32 %v207_v39, %v206_v42  ;;  %476 = vmatpush3.bf16.msra.mxu1 %v475_v28  ;;  %p488_p3 = por %p487_p2, %p486_p1 }
  0x3a   :  { %v149_v44 = vadd.f32 %v148_v35, %v147_v38 }
  0x3b   :  { %v210_v53 = vadd.f32 %v209_v45, %v208_v48  ;;  %p489_p4 = pnand %p488_p3, %p482_p0 }
  0x3c   :  { %v151_v49 = vadd.f32 %v150_v41, %v149_v44 }
  0x3d   :  { %v212_v57 = vadd.f32 %v211_v50, %v210_v53 }
  0x3e   :  { %v153_v54 = vadd.f32 %v152_v47, %v151_v49 }
  0x3f   :  { %v214_v61 = vadd.f32 %v213_v55, %v212_v57 }
  0x40   :  { %v155_v58 = vadd.f32 %v154_v52, %v153_v54 }
  0x41   :  { %v216_v1 = vadd.f32 %v215_v59, %v214_v61 }
  0x42   :  { %v156_v62 = vrot.slane %v155_v58, 4 }
  0x43   :  { %v218_v6 = vadd.f32 %v217_v63, %v216_v1 }
  0x44   :  { %v157_v5 = vadd.f32 %v156_v62, %v155_v58 }
  0x45   :  { %v220_v8 = vadd.f32 %v219_v2, %v218_v6 }
  0x46   :  { %v158_v10 = vrot.slane %v157_v5, 2 }
  0x47   :  { %v222_v11 = vadd.f32 %v221_v7, %v220_v8 }
  0x48   :  { %v159_v13 = vadd.f32 %v158_v10, %v157_v5 }
  0x49   :  { %v224_v12 = vadd.f32 %v223_v9, %v222_v11 }
  0x4a   :  { %v160_v16 = vrot.slane %v159_v13, 1 }
  0x4b   :  { %v225_v14 = vrot.slane %v224_v12, 4 }
  0x4c   :  { %v161_v19 = vadd.f32 %v160_v16, %v159_v13 }
  0x4d   :  { %v226_v15 = vadd.f32 %v225_v14, %v224_v12 }
  0x4f   :  { %v227_v17 = vrot.slane %v226_v15, 2 }
  0x51   :  { %v228_v18 = vadd.f32 %v227_v17, %v226_v15 }
  0x53   :  { %v229_v20 = vrot.slane %v228_v18, 1 }
  0x55   :  { %v230_v22 = vadd.f32 %v229_v20, %v228_v18 }
  0x57   :  { %v234_v23 = vsel %vm233_vm3, %v230_v22, %v161_v19 }
  0x58   :  { %v236_v24 = vadd.f32 %v234_v23, %v91_v21 }
  0x5a   :  { %238 = vst.msk [vmem:[#allocation2] sm:$0x3] %vm25_vm0, %v236_v24 }
  0x61   :  { %v242_v25 = vld [vmem:[#allocation2] sm:$0x3] }
  0x62   :  { %v243_v26 = vmul.f32 0.00390625, %v242_v25 }
  0x64   :  { %452 = vmatmul.mubr.msk.f32.vlgmr.msra.gmra.mrb[0].mxu0 %vm92_vm1, %v243_v26 }
 0x137   :  { %v324_v30 = vpop.f32.mrb[0].mxu0 }
 0x138   :  { %v325_v31 = vadd.f32 %v429_v29, %v324_v30  ;;  %v453_v32 = vpop.f32.mrb[1].mxu0 }
 0x13a   :  { %v328_v33 = vmax.f32 %v325_v31, 0.0 }
 0x13c   :  { %463 = vmatmul.mubr.msk.f32.vlgmr.msra.gmra.mrb[0].mxu1 %vm92_vm1, %v328_v33 }
 0x20f   :  { %v409_v35 = vpop.f32.mrb[0].mxu1 }
 0x210   :  { %v410_v36 = vadd.f32 %v431_v34, %v409_v35  ;;  %v464_v37 = vpop.f32.mrb[1].mxu1 }
 0x212   :  { %414 = vst.msk [vmem:[#allocation3] sm:$0x3] %vm413_vm4, %v410_v36 }
 0x213   :  { %492 = shalt.err (!%p489_p4)
}
 0x214   :  { %s493_s12 = scalar_lea.hbm %s850_s5, 32 }
 0x215   :  { %p494_p5 = scmp.ne.s32.totalorder %s850_s5, %s493_s12  ;;  %p497_p6 = scmp.lt.u32.totalorder %s493_s12, %s850_s5 }
 0x217   :  { %p499_p7 = pnand %p497_p6, %p494_p5 }
 0x219   :  { %502 = shalt.err (!%p499_p7)
}
 0x21a   :  { %424 = dma.vmem_to_hbm [thread:$0]  %s422_s10, 32, %s850_s5, [#allocation4]  }
 0x21b   :  { %503 = dma.done.wait [#allocation4], 32  }
 0x21c   :  { %504 = vsyncadd [#allocation4], 4294967264 }
 0x21d   :  { %428 = vsyncpa [#allocation4], 1 }

</bundles_post_ra>
